<compile_context>
chip_gen: v7x
topology: tpu7x:2x2x1
jax: 0.10.0
libtpu: 0.0.40
codegen_flags: <defaults>
</compile_context>

<pallas_src>
import math

import jax
import jax.numpy as jnp
from jax import lax
from jax.experimental import pallas as pl
from jax.experimental.pallas import tpu as pltpu

_LANE = 1024        # lane axis: multiple of 128 (8 full vregs wide)
_TILE_ROWS = 512    # 512 x 1024 f32 tile = 2 MiB; in+out double-buffered = 8 MiB


def _gelu_kernel(x_ref, o_ref):
    x = x_ref[...]
    xf = x.astype(jnp.float32)
    inv_sqrt2 = 1.0 / math.sqrt(2.0)
    # exact GELU: x * 0.5 * (1 + erf(x / sqrt(2)))
    y = xf * 0.5 * (1.0 + lax.erf(xf * inv_sqrt2))
    o_ref[...] = y.astype(o_ref.dtype)


def gelu_pallas(x):
    """Exact GELU via a Pallas TPU kernel. Accepts any shape / float dtype."""
    orig_shape = x.shape
    orig_dtype = x.dtype
    n = x.size
    if n == 0:
        return x

    flat = x.reshape(-1)

    # Rows of a lane-dense (rows, _LANE) slab.
    rows = pl.cdiv(n, _LANE)
    if rows >= _TILE_ROWS:
        tile_rows = _TILE_ROWS
        rows_padded = pl.cdiv(rows, _TILE_ROWS) * _TILE_ROWS
    else:
        # Small input: one block equal to the (padded) full array dims.
        tile_rows = rows
        rows_padded = rows

    n_padded = rows_padded * _LANE
    if n_padded != n:
        flat = jnp.pad(flat, (0, n_padded - n))
    x2 = flat.reshape(rows_padded, _LANE)

    grid = (rows_padded // tile_rows,)
    out = pl.pallas_call(
        _gelu_kernel,
        out_shape=jax.ShapeDtypeStruct((rows_padded, _LANE), orig_dtype),
        grid=grid,
        in_specs=[pl.BlockSpec((tile_rows, _LANE), lambda i: (i, 0))],
        out_specs=pl.BlockSpec((tile_rows, _LANE), lambda i: (i, 0)),
        compiler_params=pltpu.CompilerParams(
            dimension_semantics=("parallel",),
        ),
    )(x2)

    out_flat = out.reshape(-1)
    if n_padded != n:
        out_flat = out_flat[:n]
    return out_flat.reshape(orig_shape)


def gelu_ref(x):
    xf = x.astype(jnp.float32)
    return (xf * 0.5 * (1.0 + lax.erf(xf / math.sqrt(2.0)))).astype(x.dtype)


if __name__ == "__main__":
    key = jax.random.PRNGKey(0)
    # NCHW-style input, small shapes: batch=2, channels=4, spatial=16x16
    x = jax.random.normal(key, (2, 4, 16, 16), dtype=jnp.float32)

    y = gelu_pallas(x)
    y = jax.block_until_ready(y)

    y_ref = gelu_ref(x)
    assert y.shape == x.shape and y.dtype == x.dtype
    assert jnp.allclose(y, y_ref, atol=1e-6, rtol=1e-6), "mismatch vs reference"

    print("KERNEL_OK")
</pallas_src>

<mosaic_0001>
module attributes {stable_mosaic.version = 11 : i64} {
  func.func @_gelu_kernel(%arg0: i32, %arg1: memref<2x1024xf32, #tpu.memory_space<vmem>>, %arg2: memref<2x1024xf32, #tpu.memory_space<vmem>>) attributes {dimension_semantics = [#tpu.dimension_semantics<parallel>], iteration_bounds = array<i64: 1>, scalar_prefetch = 0 : i64, scratch_operands = 0 : i64, tpu.core_type = #tpu.core_type<tc>, window_params = [{transform_indices = @transform_0, window_bounds = array<i64: 2, 1024>}, {transform_indices = @transform_1, window_bounds = array<i64: 2, 1024>}]} {
    %c0 = arith.constant 0 : index
    %c0_0 = arith.constant 0 : index
    %0 = vector.load %arg1[%c0, %c0_0] : memref<2x1024xf32, #tpu.memory_space<vmem>>, vector<2x1024xf32>
    %cst = arith.constant 5.000000e-01 : f32
    %1 = vector.broadcast %cst : f32 to vector<2x1024xf32>
    %2 = arith.mulf %0, %1 : vector<2x1024xf32>
    %cst_1 = arith.constant 0.707106769 : f32
    %3 = vector.broadcast %cst_1 : f32 to vector<2x1024xf32>
    %4 = arith.mulf %0, %3 : vector<2x1024xf32>
    %5 = math.erf %4 : vector<2x1024xf32>
    %cst_2 = arith.constant 1.000000e+00 : f32
    %6 = vector.broadcast %cst_2 : f32 to vector<2x1024xf32>
    %7 = arith.addf %6, %5 : vector<2x1024xf32>
    %8 = arith.mulf %2, %7 : vector<2x1024xf32>
    %c0_3 = arith.constant 0 : index
    %c0_4 = arith.constant 0 : index
    %9 = vector.load %arg2[%c0_3, %c0_4] : memref<2x1024xf32, #tpu.memory_space<vmem>>, vector<2x1024xf32>
    tpu.vector_store %arg2[%c0_3, %c0_4], %8 {strides = array<i32>} : memref<2x1024xf32, #tpu.memory_space<vmem>>, vector<2x1024xf32>,
    return
  }
  func.func @transform_0(%arg0: i32) -> (i32, i32) {
    %c0_i32 = arith.constant 0 : i32
    %c0_i32_0 = arith.constant 0 : i32
    return %arg0, %c0_i32 : i32, i32
  }
  func.func @transform_1(%arg0: i32) -> (i32, i32) {
    %c0_i32 = arith.constant 0 : i32
    %c0_i32_0 = arith.constant 0 : i32
    return %arg0, %c0_i32 : i32, i32
  }
}

</mosaic_0001>

<bundles_post_ra>
// kernel: tpu_custom_call.1
= control target key start
LH: loop header
LB: loop body
LE: loop exit
PB: predicated region body
PF: predicated region fallthrough
CT: control target
= control target key end

     0   :  { %6 = vsyncpa [#allocation3], 0  ;;  %s140_s0 = inlined_call_operand.hbm [shape: f32[2,1024], index: 0, kind: input, shape index: {}]   ;;  %s141_s1 = inlined_call_operand.hbm [shape: f32[2,1024], index: 1, kind: output, shape index: {}]  }
   0x1   :  { %7 = vsyncpa [#allocation4], 0  ;;  %s104_s6 = smov [#allocation2]   ;;  %s56_s10 = scalar_lea.hbm %s140_s0, 256 }
   0x2   :  { %s14_s7 = sshll.u32 %s104_s6, 4  ;;  %p57_p0 = scmp.ne.s32.totalorder %s140_s0, %s56_s10  ;;  %s15_s7 = int_to_ptr.vmem [resolvable:$true] %s14_s7 }
   0x3   :  { %p60_p1 = scmp.lt.u32.totalorder %s56_s10, %s140_s0 }
   0x5   :  { %p62_p2 = pnand %p60_p1, %p57_p0 }
   0x7   :  { %65 = shalt.err (!%p62_p2)
}
   0x8   :  { %s66_s15 = scalar_lea.vmem %s15_s7, 256  ;;  %p71_p4 = scmp.lt.s32.totalorder %s15_s7, %s15_s7 }
   0x9   :  { %p67_p3 = scmp.ne.s32.totalorder %s15_s7, %s66_s15  ;;  %p72_p5 = scmp.lt.s32.totalorder %s66_s15, %s66_s15 }
   0xb   :  { %p73_p6 = por %p72_p5, %p71_p4 }
   0xd   :  { %p74_p7 = pnand %p73_p6, %p67_p3 }
   0xf   :  { %77 = shalt.err (!%p74_p7)
}
  0x10   :  { %17 = dma.hbm_to_vmem [thread:$0]  %s140_s0, 256, %s15_s7, [#allocation3]  }
  0x11   :  { %100 = dma.done.wait [#allocation3], 256  }
  0x12   :  { %101 = vsyncadd [#allocation3], 4294967040  ;;  %v21_v0 = vld [vmem:[#allocation2] sm:$0xff]  ;;  %v22_v1 = vld [vmem:[#allocation2 + $0x8] sm:$0xff]  ;;  %s105_s18 = smov [#allocation5]  }
  0x13   :  { %v25_v2 = vmul.f32 0.70710677, %v21_v0  ;;  %v26_v3 = vmul.f32 0.70710677, %v22_v1  ;;  %v23_v4 = vmul.f32 0.5, %v21_v0  ;;  %v24_v6 = vmul.f32 0.5, %v22_v1 }
  0x14   :  { %s41_s19 = sshll.u32 %s105_s18, 4  ;;  %s42_s19 = int_to_ptr.vmem [resolvable:$true] %s41_s19 }
  0x15   :  { %52 = verf.f32 %v25_v2  ;;  %s78_s0 = scalar_lea.vmem %s42_s19, 256  ;;  %p83_p9 = scmp.lt.s32.totalorder %s42_s19, %s42_s19 }
  0x16   :  { %54 = verf.f32 %v26_v3  ;;  %p79_p8 = scmp.ne.s32.totalorder %s42_s19, %s78_s0  ;;  %p84_p10 = scmp.lt.s32.totalorder %s78_s0, %s78_s0 }
  0x18   :  { %p85_p11 = por %p84_p10, %p83_p9 }
  0x1a   :  { %p86_p12 = pnand %p85_p11, %p79_p8 }
  0x1f   :  { %v53_v5 = vpop.eup %52 }
  0x20   :  { %v55_v7 = vpop.eup %54  ;;  %v29_v8 = vadd.f32 1.0, %v53_v5 }
  0x21   :  { %v30_v9 = vadd.f32 1.0, %v55_v7 }
  0x22   :  { %v31_v10 = vmul.f32 %v29_v8, %v23_v4 }
  0x23   :  { %v32_v11 = vmul.f32 %v30_v9, %v24_v6 }
  0x24   :  { %33 = vst [vmem:[#allocation5] sm:$0xff] %v31_v10 }
  0x25   :  { %34 = vst [vmem:[#allocation5 + $0x8] sm:$0xff] %v32_v11 }
  0x26   :  { %89 = shalt.err (!%p86_p12)
}
  0x27   :  { %s90_s22 = scalar_lea.hbm %s141_s1, 256 }
  0x28   :  { %p91_p13 = scmp.ne.s32.totalorder %s141_s1, %s90_s22  ;;  %p94_p0 = scmp.lt.u32.totalorder %s90_s22, %s141_s1 }
  0x2a   :  { %p96_p1 = pnand %p94_p0, %p91_p13 }
  0x2c   :  { %99 = shalt.err (!%p96_p1)
}
  0x2d   :  { %44 = dma.vmem_to_hbm [thread:$0]  %s42_s19, 256, %s141_s1, [#allocation4]  }
  0x2e   :  { %102 = dma.done.wait [#allocation4], 256  }
  0x2f   :  { %103 = vsyncadd [#allocation4], 4294967040 }
  0x30   :  { %48 = vsyncpa [#allocation3], 1 }
  0x31   :  { %49 = vsyncpa [#allocation4], 1 }

</bundles_post_ra>
